<compile_context>
chip_gen: v7x
topology: tpu7x:2x2x1
jax: 0.10.0
libtpu: 0.0.40
codegen_flags: <defaults>
</compile_context>

<pallas_src>
import functools
import math

import jax
import jax.numpy as jnp
import numpy as np
from jax.experimental import pallas as pl
from jax.experimental.pallas import tpu as pltpu

EPS = 1e-5
TARGET_ELEMS = 256 * 1024          # ~1 MiB of f32 per streamed block (~85% of HBM roofline)
VMEM_LIMIT = 48 * 1024 * 1024      # explicit scoped-VMEM budget; fits v7x's 64 MiB physical VMEM


def _largest_aligned_divisor(dim, align, cap):
    """Largest multiple of `align` that divides `dim` and is <= cap; None if none exists."""
    best = None
    d = align
    cap = min(cap, dim)
    while d <= cap:
        if dim % d == 0:
            best = d
        d += align
    return best


def _largest_divisor(dim, cap):
    """Largest divisor of `dim` that is <= cap (at least 1)."""
    for d in range(max(1, min(cap, dim)), 0, -1):
        if dim % d == 0:
            return d
    return 1


def _bn_stats_kernel(x_ref, s_ref, sq_ref):
    """Pass 1: accumulate per-channel sum / sum-of-squares over (N, HW).

    grid = (num_cb, num_nb); x block = (n_blk, c_blk, HW).  The two (c_blk, 1) accumulator
    outputs keep a constant block index along the innermost ('arbitrary') batch axis, so they
    stay resident in VMEM across the reduction.  Sliced/独立 accumulators avoid the per-step
    cross-lane concatenate of the previous version.
    """
    @pl.when(pl.program_id(1) == 0)
    def _():
        s_ref[...] = jnp.zeros_like(s_ref)
        sq_ref[...] = jnp.zeros_like(sq_ref)

    x = x_ref[...].astype(jnp.float32)                              # (n_blk, c_blk, HW)
    s_ref[...] += jnp.sum(jnp.sum(x, axis=-1, keepdims=True), axis=0)       # (c_blk, 1)
    sq_ref[...] += jnp.sum(jnp.sum(x * x, axis=-1, keepdims=True), axis=0)  # (c_blk, 1)


def _ibn_normalize_kernel(x_ref, params_ref, o_ref, *, half, hw, c_blk, cb_axis):
    """Pass 2: normalize one (n_blk, c_blk, HW) tile.

    InstanceNorm stats are computed locally (full HW is on the lane axis; two-pass variance for
    accuracy); BatchNorm scale/shift come precomputed in `params`.  The IN/BN choice is a
    per-channel select on the global channel index, and the store is one fused
    y = x * scale + shift (no slicing or relayout of x).
    """
    x = x_ref[...].astype(jnp.float32)                              # (n_blk, c_blk, HW)
    inv_hw = 1.0 / hw
    mean_in = jnp.sum(x, axis=-1, keepdims=True) * inv_hw           # (n_blk, c_blk, 1)
    xc = x - mean_in
    var_in = jnp.sum(xc * xc, axis=-1, keepdims=True) * inv_hw      # (n_blk, c_blk, 1)

    p = params_ref[...]                                             # (c_blk, 4) f32
    gamma = p[None, :, 0:1]                                         # (1, c_blk, 1)
    beta = p[None, :, 1:2]
    bn_scale = p[None, :, 2:3]
    bn_shift = p[None, :, 3:4]

    scale_in = gamma * jax.lax.rsqrt(var_in + EPS)                  # (n_blk, c_blk, 1)
    shift_in = beta - mean_in * scale_in

    c0 = pl.program_id(cb_axis) * c_blk
    cidx = jax.lax.broadcasted_iota(jnp.int32, (1, c_blk, 1), 1) + c0
    is_in = cidx < half
    scale = jnp.where(is_in, scale_in, bn_scale)
    shift = jnp.where(is_in, shift_in, bn_shift)
    o_ref[...] = (x * scale + shift).astype(o_ref.dtype)


def ibn_forward(x_nchw, g_in, b_in, g_bn, b_bn, half):
    """x_nchw: (N, C, H, W) float. Returns (N, C, H, W), same dtype as the input."""
    N, C, H, W = x_nchw.shape
    HW = H * W
    C_bn = C - half
    x = x_nchw.reshape(N, C, HW)

    itemsize = jnp.dtype(x.dtype).itemsize
    align = {1: 32, 2: 16}.get(itemsize, 8)                  # sublane-packing alignment

    # ---- block sizes for pass 2 (covers all C channels): ~1 MiB f32 per streamed buffer ----
    cap_c = max(align, TARGET_ELEMS // HW)
    c_blk = _largest_aligned_divisor(C, align, cap_c)
    if c_blk is None:
        c_blk = C                                            # full channel dim is always legal
    n_blk = _largest_divisor(N, max(1, TARGET_ELEMS // (c_blk * HW)))
    num_cb, num_nb = C // c_blk, N // n_blk

    # ---- block sizes for pass 1: read only the BatchNorm half when alignment allows ----
    gcd_hc = math.gcd(half, C_bn)
    c_blk1 = _largest_aligned_divisor(gcd_hc, align, cap_c) if gcd_hc >= align else None
    if c_blk1 is not None:
        cb_off, c_stats = half // c_blk1, C_bn               # BN-half only: ~2.5x total traffic
    else:
        c_blk1, cb_off, c_stats = c_blk, 0, C                # fallback: stream all channels
    n_blk1 = _largest_divisor(N, max(1, TARGET_ELEMS // (c_blk1 * HW)))
    num_cb1, num_nb1 = c_stats // c_blk1, N // n_blk1

    # ---- Pass 1: per-channel sum / sum_sq over (N, HW) for the BN half ----
    sums, sumsqs = pl.pallas_call(
        _bn_stats_kernel,
        out_shape=(jax.ShapeDtypeStruct((c_stats, 1), jnp.float32),
                   jax.ShapeDtypeStruct((c_stats, 1), jnp.float32)),
        grid_spec=pltpu.PrefetchScalarGridSpec(
            num_scalar_prefetch=0,
            grid=(num_cb1, num_nb1),
            in_specs=[pl.BlockSpec((n_blk1, c_blk1, HW),
                                   lambda cb, n: (n, cb + cb_off, 0))],
            out_specs=[pl.BlockSpec((c_blk1, 1), lambda cb, n: (cb, 0)),
                       pl.BlockSpec((c_blk1, 1), lambda cb, n: (cb, 0))],
        ),
        compiler_params=pltpu.CompilerParams(
            dimension_semantics=("parallel", "arbitrary"),
            vmem_limit_bytes=VMEM_LIMIT),
    )(x)

    # ---- Tiny O(C) math between passes: BN scale/shift + packed (C, 4) params ----
    # TODO(synk): the BN half uses one-pass variance E[x^2]-mean^2 (f32, clamped at 0); this can
    #             lose precision when |mean| >> std (PyTorch effectively uses two-pass variance).
    inv_nhw = 1.0 / (N * HW)
    mean_all = sums[:, 0] * inv_nhw
    var_all = jnp.maximum(sumsqs[:, 0] * inv_nhw - mean_all * mean_all, 0.0)
    mean_bn = mean_all if c_stats == C_bn else mean_all[half:]
    var_bn = var_all if c_stats == C_bn else var_all[half:]

    g_in32 = jnp.ravel(g_in).astype(jnp.float32)
    b_in32 = jnp.ravel(b_in).astype(jnp.float32)
    g_bn32 = jnp.ravel(g_bn).astype(jnp.float32)
    b_bn32 = jnp.ravel(b_bn).astype(jnp.float32)
    bn_scale = g_bn32 * jax.lax.rsqrt(var_bn + EPS)
    bn_shift = b_bn32 - mean_bn * bn_scale
    zeros_in = jnp.zeros((half,), jnp.float32)
    params = jnp.stack([
        jnp.concatenate([g_in32, g_bn32]),       # gamma
        jnp.concatenate([b_in32, b_bn32]),       # beta
        jnp.concatenate([zeros_in, bn_scale]),   # BN scale (unused for IN channels)
        jnp.concatenate([zeros_in, bn_shift]),   # BN shift (unused for IN channels)
    ], axis=1)                                   # (C, 4)

    # ---- Pass 2: normalize. Lead with the larger grid axis (v7x megacore balance); when the
    #      channel axis leads, the tiny params block index is constant over the inner axis and
    #      is not re-fetched every step. ----
    cb_first = num_cb >= num_nb
    if cb_first:
        grid2 = (num_cb, num_nb)
        x_map = lambda cb, nb: (nb, cb, 0)
        p_map = lambda cb, nb: (cb, 0)
        cb_axis = 0
    else:
        grid2 = (num_nb, num_cb)
        x_map = lambda nb, cb: (nb, cb, 0)
        p_map = lambda nb, cb: (cb, 0)
        cb_axis = 1

    out = pl.pallas_call(
        functools.partial(_ibn_normalize_kernel, half=half, hw=HW,
                          c_blk=c_blk, cb_axis=cb_axis),
        out_shape=jax.ShapeDtypeStruct((N, C, HW), x.dtype),
        grid_spec=pltpu.PrefetchScalarGridSpec(
            num_scalar_prefetch=0,
            grid=grid2,
            in_specs=[pl.BlockSpec((n_blk, c_blk, HW), x_map),
                      pl.BlockSpec((c_blk, 4), p_map)],
            out_specs=pl.BlockSpec((n_blk, c_blk, HW), x_map),
        ),
        compiler_params=pltpu.CompilerParams(
            dimension_semantics=("parallel", "parallel"),
            vmem_limit_bytes=VMEM_LIMIT),
    )(x, params)

    return out.reshape(N, C, H, W)


def ibn_reference(x, g_in, b_in, g_bn, b_bn, half):
    x = x.astype(jnp.float32)
    x_in, x_bn = x[:, :half], x[:, half:]
    mu = x_in.mean(axis=(2, 3), keepdims=True)
    var = ((x_in - mu) ** 2).mean(axis=(2, 3), keepdims=True)
    y_in = (x_in - mu) / jnp.sqrt(var + EPS)
    y_in = y_in * g_in[None, :, None, None] + b_in[None, :, None, None]
    mu_b = x_bn.mean(axis=(0, 2, 3), keepdims=True)
    var_b = ((x_bn - mu_b) ** 2).mean(axis=(0, 2, 3), keepdims=True)
    y_bn = (x_bn - mu_b) / jnp.sqrt(var_b + EPS)
    y_bn = y_bn * g_bn[None, :, None, None] + b_bn[None, :, None, None]
    return jnp.concatenate([y_in, y_bn], axis=1)


if __name__ == "__main__":
    # planes=4 -> half=2; small NCHW input.
    N, C, H, W = 2, 4, 16, 16
    half = C // 2

    key = jax.random.PRNGKey(0)
    kx, k1, k2, k3, k4 = jax.random.split(key, 5)
    x = jax.random.normal(kx, (N, C, H, W), dtype=jnp.float32)
    # Deterministic, non-trivial affine params (PyTorch default init would be ones/zeros).
    g_in = 1.0 + 0.1 * jax.random.normal(k1, (half,), dtype=jnp.float32)
    b_in = 0.1 * jax.random.normal(k2, (half,), dtype=jnp.float32)
    g_bn = 1.0 + 0.1 * jax.random.normal(k3, (C - half,), dtype=jnp.float32)
    b_bn = 0.1 * jax.random.normal(k4, (C - half,), dtype=jnp.float32)

    out = ibn_forward(x, g_in, b_in, g_bn, b_bn, half)
    out = jax.block_until_ready(out)

    ref = ibn_reference(x, g_in, b_in, g_bn, b_bn, half)
    np.testing.assert_allclose(np.asarray(out), np.asarray(ref), rtol=1e-4, atol=1e-5)
    print("KERNEL_OK")
</pallas_src>

<mosaic_0001>
module attributes {stable_mosaic.version = 11 : i64} {
  func.func @_bn_stats_kernel(%arg0: i32, %arg1: i32, %arg2: memref<2x4x256xf32, #tpu.memory_space<vmem>>, %arg3: memref<4x1xf32, #tpu.memory_space<vmem>>, %arg4: memref<4x1xf32, #tpu.memory_space<vmem>>) attributes {dimension_semantics = [#tpu.dimension_semantics<parallel>, #tpu.dimension_semantics<arbitrary>], iteration_bounds = array<i64: 1, 1>, scalar_prefetch = 0 : i64, scratch_operands = 0 : i64, tpu.core_type = #tpu.core_type<tc>, window_params = [{transform_indices = @transform_0, window_bounds = array<i64: 2, 4, 256>}, {transform_indices = @transform_1, window_bounds = array<i64: 4, 1>}, {transform_indices = @transform_2, window_bounds = array<i64: 4, 1>}]} {
    %c0_i32 = arith.constant 0 : i32
    %0 = arith.cmpi eq, %arg1, %c0_i32 : i32
    %1 = arith.extui %0 : i1 to i32
    %c0_i32_0 = arith.constant 0 : i32
    %2 = arith.cmpi ne, %1, %c0_i32_0 : i32
    scf.if %2 {
      %cst_14 = arith.constant 0.000000e+00 : f32
      %17 = vector.broadcast %cst_14 : f32 to vector<4x1xf32>
      %c0_15 = arith.constant 0 : index
      %c0_16 = arith.constant 0 : index
      %18 = vector.load %arg3[%c0_15, %c0_16] : memref<4x1xf32, #tpu.memory_space<vmem>>, vector<4x1xf32>
      tpu.vector_store %arg3[%c0_15, %c0_16], %17 {strides = array<i32>} : memref<4x1xf32, #tpu.memory_space<vmem>>, vector<4x1xf32>,
      %cst_17 = arith.constant 0.000000e+00 : f32
      %19 = vector.broadcast %cst_17 : f32 to vector<4x1xf32>
      %c0_18 = arith.constant 0 : index
      %c0_19 = arith.constant 0 : index
      %20 = vector.load %arg4[%c0_18, %c0_19] : memref<4x1xf32, #tpu.memory_space<vmem>>, vector<4x1xf32>
      tpu.vector_store %arg4[%c0_18, %c0_19], %19 {strides = array<i32>} : memref<4x1xf32, #tpu.memory_space<vmem>>, vector<4x1xf32>,
    } else {
    }
    %c0 = arith.constant 0 : index
    %c0_1 = arith.constant 0 : index
    %c0_2 = arith.constant 0 : index
    %3 = vector.load %arg2[%c0, %c0_1, %c0_2] : memref<2x4x256xf32, #tpu.memory_space<vmem>>, vector<2x4x256xf32>
    %c0_3 = arith.constant 0 : index
    %c0_4 = arith.constant 0 : index
    %4 = vector.load %arg3[%c0_3, %c0_4] : memref<4x1xf32, #tpu.memory_space<vmem>>, vector<4x1xf32>
    %cst = arith.constant dense<0.000000e+00> : vector<2x4xf32>
    %5 = vector.multi_reduction <add>, %3, %cst [2] : vector<2x4x256xf32> to vector<2x4xf32>
    %6 = vector.shape_cast %5 : vector<2x4xf32> to vector<2x4x1xf32>
    %cst_5 = arith.constant dense<0.000000e+00> : vector<4x1xf32>
    %7 = vector.multi_reduction <add>, %6, %cst_5 [0] : vector<2x4x1xf32> to vector<4x1xf32>
    %8 = arith.addf %4, %7 : vector<4x1xf32>
    %c0_6 = arith.constant 0 : index
    %c0_7 = arith.constant 0 : index
    %9 = vector.load %arg3[%c0_6, %c0_7] : memref<4x1xf32, #tpu.memory_space<vmem>>, vector<4x1xf32>
    tpu.vector_store %arg3[%c0_6, %c0_7], %8 {strides = array<i32>} : memref<4x1xf32, #tpu.memory_space<vmem>>, vector<4x1xf32>,
    %c0_8 = arith.constant 0 : index
    %c0_9 = arith.constant 0 : index
    %10 = vector.load %arg4[%c0_8, %c0_9] : memref<4x1xf32, #tpu.memory_space<vmem>>, vector<4x1xf32>
    %11 = arith.mulf %3, %3 : vector<2x4x256xf32>
    %cst_10 = arith.constant dense<0.000000e+00> : vector<2x4xf32>
    %12 = vector.multi_reduction <add>, %11, %cst_10 [2] : vector<2x4x256xf32> to vector<2x4xf32>
    %13 = vector.shape_cast %12 : vector<2x4xf32> to vector<2x4x1xf32>
    %cst_11 = arith.constant dense<0.000000e+00> : vector<4x1xf32>
    %14 = vector.multi_reduction <add>, %13, %cst_11 [0] : vector<2x4x1xf32> to vector<4x1xf32>
    %15 = arith.addf %10, %14 : vector<4x1xf32>
    %c0_12 = arith.constant 0 : index
    %c0_13 = arith.constant 0 : index
    %16 = vector.load %arg4[%c0_12, %c0_13] : memref<4x1xf32, #tpu.memory_space<vmem>>, vector<4x1xf32>
    tpu.vector_store %arg4[%c0_12, %c0_13], %15 {strides = array<i32>} : memref<4x1xf32, #tpu.memory_space<vmem>>, vector<4x1xf32>,
    return
  }
  func.func @transform_0(%arg0: i32, %arg1: i32) -> (i32, i32, i32) {
    %c0_i32 = arith.constant 0 : i32
    %0 = arith.addi %arg0, %c0_i32 : i32
    %c0_i32_0 = arith.constant 0 : i32
    %c0_i32_1 = arith.constant 0 : i32
    return %arg1, %0, %c0_i32_0 : i32, i32, i32
  }
  func.func @transform_1(%arg0: i32, %arg1: i32) -> (i32, i32) {
    %c0_i32 = arith.constant 0 : i32
    %c0_i32_0 = arith.constant 0 : i32
    return %arg0, %c0_i32 : i32, i32
  }
  func.func @transform_2(%arg0: i32, %arg1: i32) -> (i32, i32) {
    %c0_i32 = arith.constant 0 : i32
    %c0_i32_0 = arith.constant 0 : i32
    return %arg0, %c0_i32 : i32, i32
  }
}

</mosaic_0001>

<bundles_post_ra>
// kernel: tpu_custom_call.1
= control target key start
LH: loop header
LB: loop body
LE: loop exit
PB: predicated region body
PF: predicated region fallthrough
CT: control target
= control target key end

     0   :  { %8 = vsyncpa [#allocation3], 0  ;;  %s120_s9 = smov [#allocation2]   ;;  %s185_s0 = inlined_call_operand.hbm [shape: f32[2,4,256], index: 0, kind: input, shape index: {}]   ;;  %s186_s1 = inlined_call_operand.vmem [shape: f32[4,1], index: 1, kind: output, shape index: {0}]   ;;  %s187_s2 = inlined_call_operand.vmem [shape: f32[4,1], index: 2, kind: output, shape index: {1}]  }
   0x1   :  { %s14_s10 = sshll.u32 %s120_s9, 4  ;;  %s96_s13 = scalar_lea.hbm %s185_s0, 256  ;;  %s15_s10 = int_to_ptr.vmem [resolvable:$true] %s14_s10 }
   0x2   :  { %p97_p0 = scmp.ne.s32.totalorder %s185_s0, %s96_s13  ;;  %p100_p1 = scmp.lt.u32.totalorder %s96_s13, %s185_s0 }
   0x4   :  { %p102_p2 = pnand %p100_p1, %p97_p0 }
   0x6   :  { %105 = shalt.err (!%p102_p2)
}
   0x7   :  { %s106_s18 = scalar_lea.vmem %s15_s10, 256  ;;  %p111_p4 = scmp.lt.s32.totalorder %s15_s10, %s15_s10 }
   0x8   :  { %p107_p3 = scmp.ne.s32.totalorder %s15_s10, %s106_s18  ;;  %p112_p5 = scmp.lt.s32.totalorder %s106_s18, %s106_s18 }
   0xa   :  { %p113_p6 = por %p112_p5, %p111_p4 }
   0xc   :  { %p114_p7 = pnand %p113_p6, %p107_p3 }
   0xe   :  { %117 = shalt.err (!%p114_p7)
}
   0xf   :  { %s121_s19 = smov 128   ;;  %s122_s20 = smov 8  }
  0x10   :  { %20 = dma.hbm_to_vmem [thread:$0]  %s185_s0, 256, %s15_s10, [#allocation3], %s121_s19, %s121_s19, %s122_s20  }
  0x11   :  { %118 = dma.done.wait [#allocation3], 256  }
  0x12   :  { %119 = vsyncadd [#allocation3], 4294967040  ;;  %vm28_vm0 = vcmask 3072   ;;  %v123_v0 = vmov 0.0   ;;  %vm40_vm1 = vcmask 1043456   ;;  %v31_v1 = vld [vmem:[#allocation2] sm:$0xff] }
  0x13   :  { %29 = vst.msk [vmem:[%s186_s1] sm:$0xf] %vm28_vm0, %v123_v0  ;;  %30 = vst.msk [vmem:[%s187_s2] sm:$0xf] %vm28_vm0, %v123_v0  ;;  %v32_v2 = vld [vmem:[#allocation2 + $0x8] sm:$0xff]  ;;  %v36_v3 = vcombine.high %v31_v1, %v31_v1  ;;  %v41_v4 = vsel %vm40_vm1, %v31_v1, 0.0  ;;  %v58_v5 = vmul.f32 %v31_v1, %v31_v1 }
  0x14   :  { %v37_v6 = vcombine.high %v32_v2, %v32_v2  ;;  %v46_v7 = vsel %vm40_vm1, %v32_v2, 0.0  ;;  %v59_v8 = vmul.f32 %v32_v2, %v32_v2 }
  0x15   :  { %v42_v9 = vsel %vm40_vm1, %v36_v3, 0.0  ;;  %v62_v10 = vcombine.high %v58_v5, %v58_v5  ;;  %v66_v11 = vsel %vm40_vm1, %v58_v5, 0.0 }
  0x16   :  { %v47_v12 = vsel %vm40_vm1, %v37_v6, 0.0  ;;  %v43_v13 = vadd.f32 %v42_v9, %v41_v4  ;;  %v63_v14 = vcombine.high %v59_v8, %v59_v8  ;;  %v71_v16 = vsel %vm40_vm1, %v59_v8, 0.0 }
  0x17   :  { %v67_v15 = vsel %vm40_vm1, %v62_v10, 0.0  ;;  %v48_v18 = vadd.f32 %v47_v12, %v46_v7 }
  0x18   :  { %44 = vadd.xlane.f32.xlu0 %v43_v13  ;;  %v68_v17 = vadd.f32 %v67_v15, %v66_v11  ;;  %v72_v19 = vsel %vm40_vm1, %v63_v14, 0.0 }
  0x19   :  { %v73_v20 = vadd.f32 %v72_v19, %v71_v16 }
  0x1a   :  { %69 = vadd.xlane.f32.xlu1 %v68_v17  ;;  %v33_v25 = vld [vmem:[%s186_s1] sm:$0xf] }
  0x1b   :  { %v57_v30 = vld [vmem:[%s187_s2] sm:$0xf] }
  0x1c   :  { %49 = vadd.xlane.f32.xlu0 %v48_v18 }
  0x1e   :  { %74 = vadd.xlane.f32.xlu1 %v73_v20 }
  0xa5   :  { %v45_v21 = vpop.xlane.xlu0 %44 }
  0xa6   :  { %v51_v24 = vsel %vm40_vm1, %v45_v21, 0.0 }
  0xa7   :  { %v70_v22 = vpop.xlane.xlu1 %69 }
  0xa8   :  { %v76_v29 = vsel %vm40_vm1, %v70_v22, 0.0 }
  0xa9   :  { %v50_v23 = vpop.xlane.xlu0 %49 }
  0xaa   :  { %v52_v26 = vsel %vm40_vm1, %v50_v23, 0.0 }
  0xab   :  { %v53_v27 = vadd.f32 %v52_v26, %v51_v24  ;;  %v75_v28 = vpop.xlane.xlu1 %74 }
  0xac   :  { %v77_v31 = vsel %vm40_vm1, %v75_v28, 0.0 }
  0xad   :  { %v54_v32 = vadd.f32 %v53_v27, %v33_v25  ;;  %v78_v33 = vadd.f32 %v77_v31, %v76_v29 }
  0xaf   :  { %56 = vst.msk [vmem:[%s186_s1] sm:$0xf] %vm28_vm0, %v54_v32  ;;  %v79_v34 = vadd.f32 %v78_v33, %v57_v30 }
  0xb1   :  { %80 = vst.msk [vmem:[%s187_s2] sm:$0xf] %vm28_vm0, %v79_v34 }
  0xb2   :  { %89 = vsyncpa [#allocation3], 1 }

</bundles_post_ra>
